<compile_context>
chip_gen: v5e
topology: v5e:2x2
jax: 0.10.0
libtpu: 0.0.40
codegen_flags: <defaults>
</compile_context>

<pallas_src>
import math

import jax
import jax.numpy as jnp
from jax.experimental import pallas as pl
from jax.experimental.pallas import tpu as pltpu

BLOCK = 8        # T  (sequence / block length)
CLASSES = 4      # C  (number of classes)
OUT_SIZE = 4     # F  (per-class feature width produced by lc21 / lc22)
INPUT_SIZE = 2   # last dim of the module input

_SQRT_HALF = 0.7071067811865476


def _gelu(x):
    # exact (erf-based) GELU, matching torch.nn.GELU() default (approximate='none')
    return 0.5 * x * (1.0 + jax.lax.erf(x * _SQRT_HALF))


# ---------------------------------------------------------------------------
# Fused LNN forward kernel (class-folded, single packed-weight operand)
# ---------------------------------------------------------------------------
def _make_kernel(offs):
    """offs: name -> (row_offset, rows, cols) into the packed (R,128) buffer."""

    def kernel(x_ref, w_ref, y_ref):
        f32 = jnp.float32

        def W(name):
            r0, r, c = offs[name]
            return w_ref[r0:r0 + r, 0:c]        # static slice: zero runtime cost

        x = x_ref[...]                           # (BT, C*2), class c at cols [2c, 2c+1]

        # lc1 (block-diag) -> gelu : per-class 2->8, lane-packed to (BT, 32)
        pre = _gelu(jnp.dot(x, W("w1bd"), preferred_element_type=f32) + W("b1t"))

        # lc21 / lc22 (block-diag) : (BT, 16) each, class c at cols [4c:4c+4]
        x1 = jnp.dot(pre, W("w21bd"), preferred_element_type=f32) + W("b21t")
        x2 = jnp.dot(pre, W("w22bd"), preferred_element_type=f32) + W("b22t")
        a = _gelu(x1)

        # ftc1 / ftc2 : the (B,T,C*F) view is exactly the lane packing above
        ftc = _gelu(jnp.dot(a, W("wf1"), preferred_element_type=f32) + W("bf1"))      # (BT, 4)
        fbc_in = _gelu(jnp.dot(x2, W("wf2"), preferred_element_type=f32) + W("bf2"))  # (BT, 2)

        # fbc1: interleaved (B, T*2) contraction as per-row FMA + one-hot pooling
        contrib = fbc_in[:, 0:1] * W("wbe") + fbc_in[:, 1:2] * W("wbo")               # (BT, 4)
        fbc_pre = jnp.dot(W("pool"), contrib, preferred_element_type=f32) + W("bb")   # (B, 4)
        fbc_g = _gelu(fbc_pre)                                                        # (B, 4)

        # lc3 (block-structured over the [fbc|ftc|inp] slab, lane-packed classes)
        # fbc contribution computed per batch (N=128) then broadcast via matmul (N=128)
        h_fbc = jnp.dot(W("bcast"),
                        jnp.dot(fbc_g, W("w3fbc"), preferred_element_type=f32),
                        preferred_element_type=f32)                                    # (BT, 128)
        h3 = _gelu(h_fbc
                   + jnp.dot(ftc, W("w3ftc"), preferred_element_type=f32)
                   + jnp.dot(x, W("w3inp"), preferred_element_type=f32)
                   + W("b3t"))                                                         # (BT, 128)

        # lc4 / lc5 (block-diag) -> relu, one dense (BT, 4) store
        h4 = _gelu(jnp.dot(h3, W("w4bd"), preferred_element_type=f32) + W("b4t"))      # (BT, 64)
        y = jnp.dot(h4, W("w5bd"), preferred_element_type=f32) + W("b5t")              # (BT, 4)
        y_ref[...] = jnp.maximum(y, 0.0)

    return kernel


# ---------------------------------------------------------------------------
# Host-side packing: block-diagonalize per-class weights and pack everything
# into one (R, 128) f32 buffer with 8-row-aligned segments.
# ---------------------------------------------------------------------------
def _pack_operands(params, B, T, C):
    f32 = jnp.float32

    def bd(w):                                  # block-diagonal over classes
        return jnp.kron(jnp.eye(C, dtype=f32), w.astype(f32))

    def tile_b(b):                              # tile a (1, fo) bias over classes
        return jnp.tile(b.astype(f32), (1, C))

    w1, b1 = params["lc1"]
    w21, b21 = params["lc21"]
    w22, b22 = params["lc22"]
    wf1, bf1 = params["ftc1"]
    wf2, bf2 = params["ftc2"]
    wb, bb = params["fbc1"]
    w3, b3 = params["lc3"]
    w4, b4 = params["lc4"]
    w5, b5 = params["lc5"]

    BT = B * T
    bt_batch = jnp.arange(BT, dtype=jnp.int32) // T
    pool = (bt_batch[None, :] == jnp.arange(B, dtype=jnp.int32)[:, None]).astype(f32)  # (B, BT)
    bcast = pool.T                                                                      # (BT, B)

    ops = [
        ("w1bd", bd(w1)),                        # (8, 32)
        ("b1t", tile_b(b1)),                     # (1, 32)
        ("w21bd", bd(w21)),                      # (32, 16)
        ("b21t", tile_b(b21)),                   # (1, 16)
        ("w22bd", bd(w22)),                      # (32, 16)
        ("b22t", tile_b(b22)),                   # (1, 16)
        ("wf1", wf1.astype(f32)),                # (16, 4)
        ("bf1", bf1.astype(f32)),                # (1, 4)
        ("wf2", wf2.astype(f32)),                # (16, 2)
        ("bf2", bf2.astype(f32)),                # (1, 2)
        ("wbe", jnp.tile(wb[0::2, :].astype(f32), (B, 1))),   # (BT, 4)  fbc1 rows j=0
        ("wbo", jnp.tile(wb[1::2, :].astype(f32), (B, 1))),   # (BT, 4)  fbc1 rows j=1
        ("bb", bb.astype(f32)),                  # (1, 4)
        ("pool", pool),                          # (B, BT)
        ("bcast", bcast),                        # (BT, B)
        ("w3fbc", jnp.tile(w3[0:4, :].astype(f32), (1, C))),  # (4, 128) fbc feeds all class blocks
        ("w3ftc", bd(w3[4:5, :])),               # (4, 128) ftc_c feeds only class block c
        ("w3inp", bd(w3[5:7, :])),               # (8, 128) inp_c feeds only class block c
        ("b3t", tile_b(b3)),                     # (1, 128)
        ("w4bd", bd(w4)),                        # (128, 64)
        ("b4t", tile_b(b4)),                     # (1, 64)
        ("w5bd", bd(w5)),                        # (64, 4)
        ("b5t", tile_b(b5)),                     # (1, 4)
    ]

    offs = {}
    blocks = []
    row = 0
    for name, arr in ops:
        r, c = arr.shape
        rp = -(-r // 8) * 8                      # 8-row aligned segment
        block = jnp.zeros((rp, 128), f32).at[:r, :c].set(arr)
        blocks.append(block)
        offs[name] = (row, r, c)
        row += rp
    packed = jnp.concatenate(blocks, axis=0)     # single (R, 128) operand, one DMA
    return packed, offs


# ---------------------------------------------------------------------------
# Parameters (deterministic in-script init; shapes from LNN.__init__)
# ---------------------------------------------------------------------------
def init_params(key):
    specs = {
        "lc1":  (INPUT_SIZE, 8),
        "lc21": (8, OUT_SIZE),
        "lc22": (8, OUT_SIZE),
        "ftc1": (OUT_SIZE * CLASSES, CLASSES),
        "ftc2": (OUT_SIZE * CLASSES, 2),
        "fbc1": (BLOCK * 2, 4),
        "lc3":  (4 + 1 + INPUT_SIZE, 32),
        "lc4":  (32, 16),
        "lc5":  (16, 1),
    }
    params = {}
    keys = jax.random.split(key, len(specs))
    for k, (name, (fi, fo)) in zip(keys, specs.items()):
        kw, kb = jax.random.split(k)
        bound = 1.0 / math.sqrt(fi)   # mimic torch.nn.Linear default init range
        params[name] = (
            jax.random.uniform(kw, (fi, fo), jnp.float32, -bound, bound),  # (in, out)
            jax.random.uniform(kb, (1, fo), jnp.float32, -bound, bound),   # bias
        )
    return params


# ---------------------------------------------------------------------------
# LNN forward (single fused Pallas call; weights packed once at setup)
# ---------------------------------------------------------------------------
def prepare_lnn(params, B, T=BLOCK, C=CLASSES):
    packed, offs = _pack_operands(params, B, T, C)   # host-side, runs once
    kernel = _make_kernel(offs)
    BT = B * T
    vmem = pl.BlockSpec(memory_space=pltpu.MemorySpace.VMEM)

    @jax.jit
    def forward(inp):
        # (B, T, C, 2) -> (BT, C*2): contiguous flatten, class features on lanes
        x2d = inp.reshape(BT, C * INPUT_SIZE).astype(jnp.float32)
        y2d = pl.pallas_call(
            kernel,
            out_shape=jax.ShapeDtypeStruct((BT, C), jnp.float32),
            in_specs=[vmem, vmem],
            out_specs=vmem,
        )(x2d, packed)
        return y2d.reshape(B, T, C, 1)

    return forward


# ---------------------------------------------------------------------------
# Pure-JAX reference (for validation only)
# ---------------------------------------------------------------------------
def lnn_reference(inp, params):
    def lin(name, v):
        w, b = params[name]
        return v @ w + b[0]

    x = lin("lc1", inp.astype(jnp.float32))
    pre = _gelu(x)
    x1 = lin("lc21", pre)
    x2 = lin("lc22", pre)
    a = _gelu(x1)
    B, T, C, F = a.shape
    ftc_out = _gelu(lin("ftc1", a.reshape(B, T, C * F))).reshape(B, T, C, 1)
    fbc_in = _gelu(lin("ftc2", x2.reshape(B, T, C * F))).reshape(B, T * 2)
    fbc_out = _gelu(lin("fbc1", fbc_in)).reshape(B, 1, 1, 4)
    fbc_out = jnp.broadcast_to(fbc_out, (B, T, C, 4))
    pre_data = jnp.concatenate([fbc_out, ftc_out, inp.astype(jnp.float32)], axis=-1)
    h = _gelu(lin("lc3", pre_data))
    h = _gelu(lin("lc4", h))
    return jnp.maximum(lin("lc5", h), 0.0)        # (B, T, C, 1)


if __name__ == "__main__":
    key = jax.random.PRNGKey(0)
    kx, kp = jax.random.split(key, 2)

    B = 2
    inp = jax.random.normal(kx, (B, BLOCK, CLASSES, INPUT_SIZE), jnp.float32)
    params = init_params(kp)

    forward = prepare_lnn(params, B)
    out = jax.block_until_ready(forward(inp))
    ref = jax.block_until_ready(lnn_reference(inp, params))

    assert out.shape == (B, BLOCK, CLASSES, 1), out.shape
    assert bool(jnp.all(jnp.isfinite(out)))
    max_err = float(jnp.max(jnp.abs(out - ref)))
    assert max_err <= 1e-4, ("mismatch vs reference", max_err)
    print("KERNEL_OK")
</pallas_src>

<mosaic_0001>
module attributes {stable_mosaic.version = 11 : i64} {
  func.func @kernel(%arg0: memref<16x8xf32, #tpu.memory_space<vmem>>, %arg1: memref<448x128xf32, #tpu.memory_space<vmem>>, %arg2: memref<16x4xf32, #tpu.memory_space<vmem>>) attributes {dimension_semantics = [], scalar_prefetch = 0 : i64, scratch_operands = 0 : i64, tpu.core_type = #tpu.core_type<tc>} {
    %c0 = arith.constant 0 : index
    %c0_0 = arith.constant 0 : index
    %0 = vector.load %arg0[%c0, %c0_0] : memref<16x8xf32, #tpu.memory_space<vmem>>, vector<16x8xf32>
    %c0_1 = arith.constant 0 : index
    %c0_2 = arith.constant 0 : index
    %1 = vector.load %arg1[%c0_1, %c0_2] : memref<448x128xf32, #tpu.memory_space<vmem>>, vector<8x32xf32>
    %cst = arith.constant dense<0.000000e+00> : vector<16x32xf32>
    %2 = tpu.matmul %0, %1, %cst {dimension_numbers = #tpu.dot_dimension_numbers<[1], [0], [0], [1], [0, 0, 1, 1], [], []>} : vector<16x8xf32>, vector<8x32xf32>, vector<16x32xf32> -> vector<16x32xf32>
    %c8 = arith.constant 8 : index
    %c0_3 = arith.constant 0 : index
    %3 = vector.load %arg1[%c8, %c0_3] : memref<448x128xf32, #tpu.memory_space<vmem>>, vector<1x32xf32>
    %4 = vector.broadcast %3 : vector<1x32xf32> to vector<16x32xf32>
    %5 = arith.addf %2, %4 : vector<16x32xf32>
    %cst_4 = arith.constant 5.000000e-01 : f32
    %6 = vector.broadcast %cst_4 : f32 to vector<16x32xf32>
    %7 = arith.mulf %6, %5 : vector<16x32xf32>
    %cst_5 = arith.constant 0.707106769 : f32
    %8 = vector.broadcast %cst_5 : f32 to vector<16x32xf32>
    %9 = arith.mulf %5, %8 : vector<16x32xf32>
    %10 = math.erf %9 : vector<16x32xf32>
    %cst_6 = arith.constant 1.000000e+00 : f32
    %11 = vector.broadcast %cst_6 : f32 to vector<16x32xf32>
    %12 = arith.addf %11, %10 : vector<16x32xf32>
    %13 = arith.mulf %7, %12 : vector<16x32xf32>
    %c16 = arith.constant 16 : index
    %c0_7 = arith.constant 0 : index
    %14 = vector.load %arg1[%c16, %c0_7] : memref<448x128xf32, #tpu.memory_space<vmem>>, vector<32x16xf32>
    %cst_8 = arith.constant dense<0.000000e+00> : vector<16x16xf32>
    %15 = tpu.matmul %13, %14, %cst_8 {dimension_numbers = #tpu.dot_dimension_numbers<[1], [0], [0], [1], [0, 0, 1, 1], [], []>} : vector<16x32xf32>, vector<32x16xf32>, vector<16x16xf32> -> vector<16x16xf32>
    %c48 = arith.constant 48 : index
    %c0_9 = arith.constant 0 : index
    %16 = vector.load %arg1[%c48, %c0_9] : memref<448x128xf32, #tpu.memory_space<vmem>>, vector<1x16xf32>
    %17 = vector.broadcast %16 : vector<1x16xf32> to vector<16x16xf32>
    %18 = arith.addf %15, %17 : vector<16x16xf32>
    %c56 = arith.constant 56 : index
    %c0_10 = arith.constant 0 : index
    %19 = vector.load %arg1[%c56, %c0_10] : memref<448x128xf32, #tpu.memory_space<vmem>>, vector<32x16xf32>
    %cst_11 = arith.constant dense<0.000000e+00> : vector<16x16xf32>
    %20 = tpu.matmul %13, %19, %cst_11 {dimension_numbers = #tpu.dot_dimension_numbers<[1], [0], [0], [1], [0, 0, 1, 1], [], []>} : vector<16x32xf32>, vector<32x16xf32>, vector<16x16xf32> -> vector<16x16xf32>
    %c88 = arith.constant 88 : index
    %c0_12 = arith.constant 0 : index
    %21 = vector.load %arg1[%c88, %c0_12] : memref<448x128xf32, #tpu.memory_space<vmem>>, vector<1x16xf32>
    %22 = vector.broadcast %21 : vector<1x16xf32> to vector<16x16xf32>
    %23 = arith.addf %20, %22 : vector<16x16xf32>
    %cst_13 = arith.constant 5.000000e-01 : f32
    %24 = vector.broadcast %cst_13 : f32 to vector<16x16xf32>
    %25 = arith.mulf %24, %18 : vector<16x16xf32>
    %cst_14 = arith.constant 0.707106769 : f32
    %26 = vector.broadcast %cst_14 : f32 to vector<16x16xf32>
    %27 = arith.mulf %18, %26 : vector<16x16xf32>
    %28 = math.erf %27 : vector<16x16xf32>
    %cst_15 = arith.constant 1.000000e+00 : f32
    %29 = vector.broadcast %cst_15 : f32 to vector<16x16xf32>
    %30 = arith.addf %29, %28 : vector<16x16xf32>
    %31 = arith.mulf %25, %30 : vector<16x16xf32>
    %c96 = arith.constant 96 : index
    %c0_16 = arith.constant 0 : index
    %32 = vector.load %arg1[%c96, %c0_16] : memref<448x128xf32, #tpu.memory_space<vmem>>, vector<16x4xf32>
    %cst_17 = arith.constant dense<0.000000e+00> : vector<16x4xf32>
    %33 = tpu.matmul %31, %32, %cst_17 {dimension_numbers = #tpu.dot_dimension_numbers<[1], [0], [0], [1], [0, 0, 1, 1], [], []>} : vector<16x16xf32>, vector<16x4xf32>, vector<16x4xf32> -> vector<16x4xf32>
    %c112 = arith.constant 112 : index
    %c0_18 = arith.constant 0 : index
    %34 = vector.load %arg1[%c112, %c0_18] : memref<448x128xf32, #tpu.memory_space<vmem>>, vector<1x4xf32>
    %35 = vector.broadcast %34 : vector<1x4xf32> to vector<16x4xf32>
    %36 = arith.addf %33, %35 : vector<16x4xf32>
    %cst_19 = arith.constant 5.000000e-01 : f32
    %37 = vector.broadcast %cst_19 : f32 to vector<16x4xf32>
    %38 = arith.mulf %37, %36 : vector<16x4xf32>
    %cst_20 = arith.constant 0.707106769 : f32
    %39 = vector.broadcast %cst_20 : f32 to vector<16x4xf32>
    %40 = arith.mulf %36, %39 : vector<16x4xf32>
    %41 = math.erf %40 : vector<16x4xf32>
    %cst_21 = arith.constant 1.000000e+00 : f32
    %42 = vector.broadcast %cst_21 : f32 to vector<16x4xf32>
    %43 = arith.addf %42, %41 : vector<16x4xf32>
    %44 = arith.mulf %38, %43 : vector<16x4xf32>
    %c120 = arith.constant 120 : index
    %c0_22 = arith.constant 0 : index
    %45 = vector.load %arg1[%c120, %c0_22] : memref<448x128xf32, #tpu.memory_space<vmem>>, vector<16x2xf32>
    %cst_23 = arith.constant dense<0.000000e+00> : vector<16x2xf32>
    %46 = tpu.matmul %23, %45, %cst_23 {dimension_numbers = #tpu.dot_dimension_numbers<[1], [0], [0], [1], [0, 0, 1, 1], [], []>} : vector<16x16xf32>, vector<16x2xf32>, vector<16x2xf32> -> vector<16x2xf32>
    %c136 = arith.constant 136 : index
    %c0_24 = arith.constant 0 : index
    %47 = vector.load %arg1[%c136, %c0_24] : memref<448x128xf32, #tpu.memory_space<vmem>>, vector<1x2xf32>
    %48 = vector.broadcast %47 : vector<1x2xf32> to vector<16x2xf32>
    %49 = arith.addf %46, %48 : vector<16x2xf32>
    %cst_25 = arith.constant 5.000000e-01 : f32
    %50 = vector.broadcast %cst_25 : f32 to vector<16x2xf32>
    %51 = arith.mulf %50, %49 : vector<16x2xf32>
    %cst_26 = arith.constant 0.707106769 : f32
    %52 = vector.broadcast %cst_26 : f32 to vector<16x2xf32>
    %53 = arith.mulf %49, %52 : vector<16x2xf32>
    %54 = math.erf %53 : vector<16x2xf32>
    %cst_27 = arith.constant 1.000000e+00 : f32
    %55 = vector.broadcast %cst_27 : f32 to vector<16x2xf32>
    %56 = arith.addf %55, %54 : vector<16x2xf32>
    %57 = arith.mulf %51, %56 : vector<16x2xf32>
    %58 = vector.extract_strided_slice %57 {offsets = [0, 0], sizes = [16, 1], strides = [1, 1]} : vector<16x2xf32> to vector<16x1xf32>
    %c144 = arith.constant 144 : index
    %c0_28 = arith.constant 0 : index
    %59 = vector.load %arg1[%c144, %c0_28] : memref<448x128xf32, #tpu.memory_space<vmem>>, vector<16x4xf32>
    %60 = vector.broadcast %58 : vector<16x1xf32> to vector<16x4xf32>
    %61 = arith.mulf %60, %59 : vector<16x4xf32>
    %62 = vector.extract_strided_slice %57 {offsets = [0, 1], sizes = [16, 1], strides = [1, 1]} : vector<16x2xf32> to vector<16x1xf32>
    %c160 = arith.constant 160 : index
    %c0_29 = arith.constant 0 : index
    %63 = vector.load %arg1[%c160, %c0_29] : memref<448x128xf32, #tpu.memory_space<vmem>>, vector<16x4xf32>
    %64 = vector.broadcast %62 : vector<16x1xf32> to vector<16x4xf32>
    %65 = arith.mulf %64, %63 : vector<16x4xf32>
    %66 = arith.addf %61, %65 : vector<16x4xf32>
    %c184 = arith.constant 184 : index
    %c0_30 = arith.constant 0 : index
    %67 = vector.load %arg1[%c184, %c0_30] : memref<448x128xf32, #tpu.memory_space<vmem>>, vector<2x16xf32>
    %cst_31 = arith.constant dense<0.000000e+00> : vector<2x4xf32>
    %68 = tpu.matmul %67, %66, %cst_31 {dimension_numbers = #tpu.dot_dimension_numbers<[1], [0], [0], [1], [0, 0, 1, 1], [], []>} : vector<2x16xf32>, vector<16x4xf32>, vector<2x4xf32> -> vector<2x4xf32>
    %c176 = arith.constant 176 : index
    %c0_32 = arith.constant 0 : index
    %69 = vector.load %arg1[%c176, %c0_32] : memref<448x128xf32, #tpu.memory_space<vmem>>, vector<1x4xf32>
    %70 = vector.broadcast %69 : vector<1x4xf32> to vector<2x4xf32>
    %71 = arith.addf %68, %70 : vector<2x4xf32>
    %cst_33 = arith.constant 5.000000e-01 : f32
    %72 = vector.broadcast %cst_33 : f32 to vector<2x4xf32>
    %73 = arith.mulf %72, %71 : vector<2x4xf32>
    %cst_34 = arith.constant 0.707106769 : f32
    %74 = vector.broadcast %cst_34 : f32 to vector<2x4xf32>
    %75 = arith.mulf %71, %74 : vector<2x4xf32>
    %76 = math.erf %75 : vector<2x4xf32>
    %cst_35 = arith.constant 1.000000e+00 : f32
    %77 = vector.broadcast %cst_35 : f32 to vector<2x4xf32>
    %78 = arith.addf %77, %76 : vector<2x4xf32>
    %79 = arith.mulf %73, %78 : vector<2x4xf32>
    %c192 = arith.constant 192 : index
    %c0_36 = arith.constant 0 : index
    %80 = vector.load %arg1[%c192, %c0_36] : memref<448x128xf32, #tpu.memory_space<vmem>>, vector<16x2xf32>
    %c208 = arith.constant 208 : index
    %c0_37 = arith.constant 0 : index
    %81 = vector.load %arg1[%c208, %c0_37] : memref<448x128xf32, #tpu.memory_space<vmem>>, vector<4x128xf32>
    %cst_38 = arith.constant dense<0.000000e+00> : vector<2x128xf32>
    %82 = tpu.matmul %79, %81, %cst_38 {dimension_numbers = #tpu.dot_dimension_numbers<[1], [0], [0], [1], [0, 0, 1, 1], [], []>} : vector<2x4xf32>, vector<4x128xf32>, vector<2x128xf32> -> vector<2x128xf32>
    %cst_39 = arith.constant dense<0.000000e+00> : vector<16x128xf32>
    %83 = tpu.matmul %80, %82, %cst_39 {dimension_numbers = #tpu.dot_dimension_numbers<[1], [0], [0], [1], [0, 0, 1, 1], [], []>} : vector<16x2xf32>, vector<2x128xf32>, vector<16x128xf32> -> vector<16x128xf32>
    %c216 = arith.constant 216 : index
    %c0_40 = arith.constant 0 : index
    %84 = vector.load %arg1[%c216, %c0_40] : memref<448x128xf32, #tpu.memory_space<vmem>>, vector<4x128xf32>
    %cst_41 = arith.constant dense<0.000000e+00> : vector<16x128xf32>
    %85 = tpu.matmul %44, %84, %cst_41 {dimension_numbers = #tpu.dot_dimension_numbers<[1], [0], [0], [1], [0, 0, 1, 1], [], []>} : vector<16x4xf32>, vector<4x128xf32>, vector<16x128xf32> -> vector<16x128xf32>
    %86 = arith.addf %83, %85 : vector<16x128xf32>
    %c224 = arith.constant 224 : index
    %c0_42 = arith.constant 0 : index
    %87 = vector.load %arg1[%c224, %c0_42] : memref<448x128xf32, #tpu.memory_space<vmem>>, vector<8x128xf32>
    %cst_43 = arith.constant dense<0.000000e+00> : vector<16x128xf32>
    %88 = tpu.matmul %0, %87, %cst_43 {dimension_numbers = #tpu.dot_dimension_numbers<[1], [0], [0], [1], [0, 0, 1, 1], [], []>} : vector<16x8xf32>, vector<8x128xf32>, vector<16x128xf32> -> vector<16x128xf32>
    %89 = arith.addf %86, %88 : vector<16x128xf32>
    %c232 = arith.constant 232 : index
    %c0_44 = arith.constant 0 : index
    %90 = vector.load %arg1[%c232, %c0_44] : memref<448x128xf32, #tpu.memory_space<vmem>>, vector<1x128xf32>
    %91 = vector.broadcast %90 : vector<1x128xf32> to vector<16x128xf32>
    %92 = arith.addf %89, %91 : vector<16x128xf32>
    %cst_45 = arith.constant 5.000000e-01 : f32
    %93 = vector.broadcast %cst_45 : f32 to vector<16x128xf32>
    %94 = arith.mulf %93, %92 : vector<16x128xf32>
    %cst_46 = arith.constant 0.707106769 : f32
    %95 = vector.broadcast %cst_46 : f32 to vector<16x128xf32>
    %96 = arith.mulf %92, %95 : vector<16x128xf32>
    %97 = math.erf %96 : vector<16x128xf32>
    %cst_47 = arith.constant 1.000000e+00 : f32
    %98 = vector.broadcast %cst_47 : f32 to vector<16x128xf32>
    %99 = arith.addf %98, %97 : vector<16x128xf32>
    %100 = arith.mulf %94, %99 : vector<16x128xf32>
    %c240 = arith.constant 240 : index
    %c0_48 = arith.constant 0 : index
    %101 = vector.load %arg1[%c240, %c0_48] : memref<448x128xf32, #tpu.memory_space<vmem>>, vector<128x64xf32>
    %cst_49 = arith.constant dense<0.000000e+00> : vector<16x64xf32>
    %102 = tpu.matmul %100, %101, %cst_49 {dimension_numbers = #tpu.dot_dimension_numbers<[1], [0], [0], [1], [0, 0, 1, 1], [], []>} : vector<16x128xf32>, vector<128x64xf32>, vector<16x64xf32> -> vector<16x64xf32>
    %c368 = arith.constant 368 : index
    %c0_50 = arith.constant 0 : index
    %103 = vector.load %arg1[%c368, %c0_50] : memref<448x128xf32, #tpu.memory_space<vmem>>, vector<1x64xf32>
    %104 = vector.broadcast %103 : vector<1x64xf32> to vector<16x64xf32>
    %105 = arith.addf %102, %104 : vector<16x64xf32>
    %cst_51 = arith.constant 5.000000e-01 : f32
    %106 = vector.broadcast %cst_51 : f32 to vector<16x64xf32>
    %107 = arith.mulf %106, %105 : vector<16x64xf32>
    %cst_52 = arith.constant 0.707106769 : f32
    %108 = vector.broadcast %cst_52 : f32 to vector<16x64xf32>
    %109 = arith.mulf %105, %108 : vector<16x64xf32>
    %110 = math.erf %109 : vector<16x64xf32>
    %cst_53 = arith.constant 1.000000e+00 : f32
    %111 = vector.broadcast %cst_53 : f32 to vector<16x64xf32>
    %112 = arith.addf %111, %110 : vector<16x64xf32>
    %113 = arith.mulf %107, %112 : vector<16x64xf32>
    %c376 = arith.constant 376 : index
    %c0_54 = arith.constant 0 : index
    %114 = vector.load %arg1[%c376, %c0_54] : memref<448x128xf32, #tpu.memory_space<vmem>>, vector<64x4xf32>
    %cst_55 = arith.constant dense<0.000000e+00> : vector<16x4xf32>
    %115 = tpu.matmul %113, %114, %cst_55 {dimension_numbers = #tpu.dot_dimension_numbers<[1], [0], [0], [1], [0, 0, 1, 1], [], []>} : vector<16x64xf32>, vector<64x4xf32>, vector<16x4xf32> -> vector<16x4xf32>
    %c440 = arith.constant 440 : index
    %c0_56 = arith.constant 0 : index
    %116 = vector.load %arg1[%c440, %c0_56] : memref<448x128xf32, #tpu.memory_space<vmem>>, vector<1x4xf32>
    %117 = vector.broadcast %116 : vector<1x4xf32> to vector<16x4xf32>
    %118 = arith.addf %115, %117 : vector<16x4xf32>
    %cst_57 = arith.constant 0.000000e+00 : f32
    %119 = vector.broadcast %cst_57 : f32 to vector<16x4xf32>
    %120 = arith.maximumf %118, %119 : vector<16x4xf32>
    %c0_58 = arith.constant 0 : index
    %c0_59 = arith.constant 0 : index
    %121 = vector.load %arg2[%c0_58, %c0_59] : memref<16x4xf32, #tpu.memory_space<vmem>>, vector<16x4xf32>
    tpu.vector_store %arg2[%c0_58, %c0_59], %120 {strides = array<i32>} : memref<16x4xf32, #tpu.memory_space<vmem>>, vector<16x4xf32>,
    return
  }
}

</mosaic_0001>

<bundles_post_ra>
// kernel: forward.1
= control target key start
LH: loop header
LB: loop body
LE: loop exit
PB: predicated region body
PF: predicated region fallthrough
CT: control target
= control target key end

     0   :  { %7 = vsyncpa [#allocation3], 0  ;;  %s1147_s12 = smov [#allocation2]   ;;  %s1148_s14 = smov 128   ;;  %s1324_s0 = inlined_call_operand.vmem [shape: f32[16,8], index: 0, kind: input, shape index: {}]   ;;  %s1325_s1 = inlined_call_operand.hbm [shape: f32[448,128], index: 1, kind: input, shape index: {}]   ;;  %s1326_s2 = inlined_call_operand.vmem [shape: f32[16,4], index: 2, kind: output, shape index: {}]  }
   0x1   :  { %s14_s11 = sshll.u32 %s1325_s1, 4  ;;  %s16_s13 = sshll.u32 %s1147_s12, 4  ;;  %s15_s11 = int_to_ptr.hbm [resolvable:$true] %s14_s11  ;;  %s17_s13 = int_to_ptr.vmem [resolvable:$true] %s16_s13 }
   0x2   :  { %s1149_s15 = smov 8  }
   0x3   :  { %22 = dma.hbm_to_vmem [thread:$0]  %s15_s11, 7168, %s17_s13, [#allocation3], %s1148_s14, %s1148_s14, %s1149_s15  }
   0x4   :  { %1145 = dma.done.wait [#allocation3], 7168  }
   0x5   :  { %1146 = vsyncadd [#allocation3], 4294960128  ;;  %vm32_vm0 = vcmask 64512   ;;  %v29_v0 = vld [vmem:[#allocation2] sm:$0xff]  ;;  %v28_v2 = vld [vmem:[%s1324_s0 + $0x8] sm:$0xff]  ;;  %vm156_vm9 = vcmask 261120  }
   0x6   :  { %v27_v1 = vld [vmem:[%s1324_s0] sm:$0xff]  ;;  %54 = vmatpush.msra.mxu1 %v29_v0  ;;  %1074 = vmatpush.msra.mxu3 %v29_v0  ;;  %v1084_v3 = vld [vmem:[#allocation2 + $0x8] ss:$0 sm:$0xff]  ;;  %v189_v25 = vld [vmem:[#allocation2 + $0x50] sm:$0xff]  ;;  %vm307_vm10 = vcmask 130048  }
   0x7   :  { %1038 = vmatmul.msk.f32.vlgmr.msra.gmra.mxu1 %vm32_vm0, %v27_v1  ;;  %1039 = vmatmul.msk.f32.vlgmr.msra.gmra.mxu3 %vm32_vm0, %v28_v2  ;;  %v153_v24 = vld [vmem:[#allocation2 + $0x28] sm:$0xff]  ;;  %v152_v29 = vld [vmem:[#allocation2 + $0x20] sm:$0xff]  ;;  %v151_v35 = vld [vmem:[#allocation2 + $0x18] sm:$0xff] }
   0x8   :  { %175 = vmatpush.msrb.mxu1 %v153_v24  ;;  %204 = vmatpush.msra.mxu2 %v189_v25  ;;  %v188_v30 = vld [vmem:[#allocation2 + $0x48] sm:$0xff]  ;;  %v187_v36 = vld [vmem:[#allocation2 + $0x40] sm:$0xff]  ;;  %v150_v38 = vld [vmem:[#allocation2 + $0x10] sm:$0xff] }
   0x9   :  { %v186_v39 = vld [vmem:[#allocation2 + $0x38] sm:$0xff] }
   0xa   :  { %176 = vmatpush.msrb.mxu1 %v152_v29  ;;  %205 = vmatpush.msra.mxu2 %v188_v30 }
   0xc   :  { %177 = vmatpush.msrb.mxu1 %v151_v35  ;;  %206 = vmatpush.msra.mxu2 %v187_v36 }
   0xe   :  { %178 = vmatpush.msrb.mxu1 %v150_v38  ;;  %207 = vmatpush.msra.mxu2 %v186_v39 }
  0x84   :  { %v56_v4 = vpop.f32.mrf.mxu1 }
  0x85   :  { %v1178_v5 = vadd.f32 %v1084_v3, %v56_v4 }
  0x87   :  { %v1181_v6 = vmul.f32 0.70710677, %v1178_v5 }
  0x89   :  { %v66_v7 = vmul.f32 %v1181_v6, %v1181_v6 }
  0x8a   :  { %v59_v8 = vpop.f32.mrf.mxu3 }
  0x8b   :  { %v67_v9 = vmin.f32 %v66_v7, 16.0  ;;  %v1185_v10 = vadd.f32 %v1084_v3, %v59_v8 }
  0x8d   :  { %v68_v11 = vmul.f32 2.1237322e-06, %v67_v9  ;;  %v79_v12 = vmul.f32 3.8918573e-05, %v67_v9  ;;  %v1188_v13 = vmul.f32 0.70710677, %v1185_v10 }
  0x8f   :  { %v69_v14 = vadd.f32 0.00028619796, %v68_v11  ;;  %v80_v15 = vadd.f32 0.001143296, %v79_v12  ;;  %v106_v16 = vmul.f32 %v1188_v13, %v1188_v13 }
  0x91   :  { %v70_v17 = vmul.f32 %v69_v14, %v67_v9  ;;  %v81_v18 = vmul.f32 %v80_v15, %v67_v9  ;;  %v1192_v19 = vmin.f32 %v106_v16, 16.0 }
  0x93   :  { %v71_v20 = vadd.f32 0.0036580483, %v70_v17  ;;  %v82_v21 = vadd.f32 0.014752088, %v81_v18  ;;  %v108_v22 = vmul.f32 2.1237322e-06, %v1192_v19 }
  0x94   :  { %v119_v23 = vmul.f32 3.8918573e-05, %v1192_v19 }
  0x95   :  { %v83_v26 = vmul.f32 %v82_v21, %v67_v9  ;;  %v109_v27 = vadd.f32 0.00028619796, %v108_v22  ;;  %v72_v32 = vmul.f32 %v71_v20, %v67_v9 }
  0x96   :  { %v120_v28 = vadd.f32 0.001143296, %v119_v23  ;;  %v62_v23 = vmul.f32 0.5, %v1178_v5  ;;  %v426_v5 = vld [vmem:[#allocation2 + $0x80] sm:$0xff] }
  0x97   :  { %v84_v31 = vadd.f32 0.112945676, %v83_v26  ;;  %v110_v33 = vmul.f32 %v109_v27, %v1192_v19  ;;  %v73_v43 = vadd.f32 0.05243302, %v72_v32  ;;  %449 = vmatpush.msra.mxu0 %v426_v5 }
  0x98   :  { %v121_v34 = vmul.f32 %v120_v28, %v1192_v19 }
  0x99   :  { %v85_v37 = vmul.f32 %v84_v31, %v67_v9  ;;  %v111_v42 = vadd.f32 0.0036580483, %v110_v33  ;;  %v74_v49 = vmul.f32 %v73_v43, %v67_v9  ;;  %v63_v31 = vmul.f32 0.5, %v1185_v10  ;;  %v425_v33 = vld [vmem:[#allocation2 + $0x78] sm:$0xff] }
  0x9a   :  { %v122_v40 = vadd.f32 0.014752088, %v121_v34  ;;  %450 = vmatpush.msra.mxu0 %v425_v33 }
  0x9b   :  { %v86_v41 = vadd.f32 0.4994258, %v85_v37  ;;  %v112_v48 = vmul.f32 %v111_v42, %v1192_v19  ;;  %v75_v53 = vadd.f32 0.18741608, %v74_v49  ;;  %v1086_v37 = vld [vmem:[#allocation2 + $0x58] ss:$0 sm:$0xff] }
  0x9c   :  { %v123_v44 = vmul.f32 %v122_v40, %v1192_v19 }
  0x9d   :  { %v87_v45 = vmul.f32 %v86_v41, %v67_v9  ;;  %v113_v52 = vadd.f32 0.05243302, %v112_v48  ;;  %v76_v58 = vmul.f32 %v75_v53, %v67_v9 }
  0x9e   :  { %v124_v46 = vadd.f32 0.112945676, %v123_v44 }
  0x9f   :  { %v88_v47 = vadd.f32 1.0, %v87_v45  ;;  %v114_v57 = vmul.f32 %v113_v52, %v1192_v19  ;;  %v77_v63 = vadd.f32 1.1283791, %v76_v58 }
  0xa0   :  { %v125_v50 = vmul.f32 %v124_v46, %v1192_v19 }
  0xa1   :  { %1093 = vrcp.f32 %v88_v47  ;;  %v100_v61 = vand.u32 2147483648, %v88_v47  ;;  %v115_v62 = vadd.f32 0.18741608, %v114_v57  ;;  %v98_v1 = vand.u32 2147483647, %v88_v47 }
  0xa2   :  { %v126_v51 = vadd.f32 0.4994258, %v125_v50  ;;  %vm94_vm2 = vweird.f32 %v88_v47  ;;  %v78_v11 = vmul.f32 %v77_v63, %v1181_v6  ;;  %v304_v63 = vld [vmem:[#allocation2 + $0x68] sm:$0xff] }
  0xa3   :  { %v101_v4 = vor.u32 1.1754944e-38, %v100_v61  ;;  %v116_v7 = vmul.f32 %v115_v62, %v1192_v19  ;;  %vm99_vm4 = vcmp.eq.f32.partialorder %v98_v1, 8.507059e+37  ;;  %328 = vmatpush.msrb.mxu3 %v304_v63 }
  0xa4   :  { %v127_v54 = vmul.f32 %v126_v51, %v1192_v19 }
  0xa5   :  { %v117_v17 = vadd.f32 1.1283791, %v116_v7 }
  0xa6   :  { %v128_v55 = vadd.f32 1.0, %v127_v54 }
  0xa7   :  { %v1094_v56 = vpop.eup %1093  ;;  %v118_v6 = vmul.f32 %v117_v17, %v1188_v13  ;;  %v1085_v13 = vld [vmem:[#allocation2 + $0x30] ss:$0 sm:$0xff] }
  0xa8   :  { %v90_v59 = vmul.f32 %v1094_v56, %v88_v47  ;;  %1095 = vrcp.f32 %v128_v55  ;;  %vm95_vm1 = vweird.f32 %v1094_v56  ;;  %v140_v16 = vand.u32 2147483648, %v128_v55 }
  0xa9   :  { %vm96_vm3 = vmor %vm94_vm2, %vm95_vm1  ;;  %v138_v20 = vand.u32 2147483647, %v128_v55  ;;  %vm134_vm6 = vweird.f32 %v128_v55 }
  0xaa   :  { %v91_v60 = vsub.f32 1.0, %v90_v59  ;;  %v141_v19 = vor.u32 1.1754944e-38, %v140_v16 }
  0xab   :  { %vm139_vm8 = vcmp.eq.f32.partialorder %v138_v20, 8.507059e+37 }
  0xac   :  { %v92_v0 = vmul.f32 %v1094_v56, %v91_v60 }
  0xae   :  { %v1096_v2 = vpop.eup %1095  ;;  %v93_v3 = vadd.f32 %v1094_v56, %v92_v0 }
  0xaf   :  { %v130_v8 = vmul.f32 %v1096_v2, %v128_v55  ;;  %vm135_vm5 = vweird.f32 %v1096_v2 }
  0xb0   :  { %v97_v9 = vsel %vm96_vm3, %v1094_v56, %v93_v3  ;;  %vm136_vm7 = vmor %vm134_vm6, %vm135_vm5  ;;  %v303_v3 = vld [vmem:[#allocation2 + $0x60] sm:$0xff] }
  0xb1   :  { %v102_v12 = vsel %vm99_vm4, %v101_v4, %v97_v9  ;;  %v131_v14 = vsub.f32 1.0, %v130_v8  ;;  %329 = vmatpush.msrb.mxu3 %v303_v3 }
  0xb2   :  { %v103_v15 = vmul.f32 %v102_v12, %v78_v11 }
  0xb3   :  { %v132_v18 = vmul.f32 %v1096_v2, %v131_v14 }
  0xb4   :  { %v1040_v21 = vclamps-f32 %v103_v15, 1.0 }
  0xb5   :  { %v133_v22 = vadd.f32 %v1096_v2, %v132_v18 }
  0xb6   :  { %v146_v24 = vadd.f32 1.0, %v1040_v21 }
  0xb7   :  { %v137_v25 = vsel %vm136_vm7, %v1096_v2, %v133_v22 }
  0xb8   :  { %v148_v26 = vmul.f32 %v146_v24, %v62_v23  ;;  %v142_v27 = vsel %vm139_vm8, %v141_v19, %v137_v25 }
  0xb9   :  { %v143_v28 = vmul.f32 %v142_v27, %v118_v6 }
  0xba   :  { %1042 = vmatmul.msk.f32.vlgmr.msrb.gmra.mxu1 %vm156_vm9, %v148_v26  ;;  %1044 = vmatmul.msk.f32.vlgmr.msra.gmra.mxu2 %vm156_vm9, %v148_v26 }
  0xbb   :  { %v1041_v29 = vclamps-f32 %v143_v28, 1.0 }
  0xbd   :  { %v147_v30 = vadd.f32 1.0, %v1041_v29 }
  0xbf   :  { %v149_v32 = vmul.f32 %v147_v30, %v63_v31 }
  0xc2   :  { %1043 = vmatmul.msk.f32.gmra.mxu1 %vm156_vm9, %v149_v32  ;;  %1045 = vmatmul.msk.f32.gmra.mxu2 %vm156_vm9, %v149_v32 }
 0x137   :  { %v180_v34 = vpop.f32.mrf.mxu1 }
 0x138   :  { %v1208_v35 = vadd.f32 %v1085_v13, %v180_v34 }
 0x13a   :  { %v1211_v36 = vmul.f32 0.70710677, %v1208_v35 }
 0x13c   :  { %v219_v38 = vmul.f32 %v1211_v36, %v1211_v36 }
 0x13d   :  { %v209_v39 = vpop.f32.mrf.mxu2 }
 0x13e   :  { %v220_v10 = vmin.f32 %v219_v38, 16.0  ;;  %v210_v40 = vadd.f32 %v1086_v37, %v209_v39 }
 0x13f   :  { %v183_v41 = vpop.f32.mrf.mxu1 }
 0x140   :  { %v221_v42 = vmul.f32 2.1237322e-06, %v220_v10  ;;  %v232_v43 = vmul.f32 3.8918573e-05, %v220_v10  ;;  %v1215_v44 = vadd.f32 %v1085_v13, %v183_v41  ;;  %1052 = vmatmul.msk.f32.vlgmr.msra.gmra.mxu0 %vm307_vm10, %v210_v40 }
 0x142   :  { %v222_v45 = vadd.f32 0.00028619796, %v221_v42  ;;  %v233_v46 = vadd.f32 0.001143296, %v232_v43  ;;  %v1219_v47 = vmul.f32 0.70710677, %v1215_v44 }
 0x144   :  { %v223_v48 = vmul.f32 %v222_v45, %v220_v10  ;;  %v234_v49 = vmul.f32 %v233_v46, %v220_v10  ;;  %v259_v50 = vmul.f32 %v1219_v47, %v1219_v47 }
 0x145   :  { %v212_v51 = vpop.f32.mrf.mxu2 }
 0x146   :  { %v235_v52 = vadd.f32 0.014752088, %v234_v49  ;;  %v213_v53 = vadd.f32 %v1086_v37, %v212_v51  ;;  %v224_v54 = vadd.f32 0.0036580483, %v223_v48  ;;  %v260_v55 = vmin.f32 %v259_v50, 16.0 }
 0x147   :  { %v215_v49 = vmul.f32 0.5, %v1208_v35  ;;  %v1087_v35 = vld [vmem:[#allocation2 + $0x88] ss:$0 sm:$0xff] }
 0x148   :  { %v236_v56 = vmul.f32 %v235_v52, %v220_v10  ;;  %1053 = vmatmul.msk.f32.gmra.mxu0 %vm307_vm10, %v213_v53  ;;  %v261_v57 = vmul.f32 2.1237322e-06, %v260_v55  ;;  %v272_v58 = vmul.f32 3.8918573e-05, %v260_v55  ;;  %v225_v60 = vmul.f32 %v224_v54, %v220_v10 }
 0x14a   :  { %v237_v59 = vadd.f32 0.112945676, %v236_v56  ;;  %v262_v61 = vadd.f32 0.00028619796, %v261_v57  ;;  %v273_v62 = vadd.f32 0.001143296, %v272_v58 }
 0x14b   :  { %v226_v7 = vadd.f32 0.05243302, %v225_v60  ;;  %v216_v58 = vmul.f32 0.5, %v1215_v44 }
 0x14c   :  { %v238_v0 = vmul.f32 %v237_v59, %v220_v10  ;;  %v263_v1 = vmul.f32 %v262_v61, %v260_v55  ;;  %v274_v2 = vmul.f32 %v273_v62, %v260_v55 }
 0x14d   :  { %v227_v15 = vmul.f32 %v226_v7, %v220_v10 }
 0x14e   :  { %v239_v4 = vadd.f32 0.4994258, %v238_v0  ;;  %v275_v8 = vadd.f32 0.014752088, %v274_v2  ;;  %v264_v9 = vadd.f32 0.0036580483, %v263_v1 }
 0x14f   :  { %v228_v20 = vadd.f32 0.18741608, %v227_v15 }
 0x150   :  { %v240_v11 = vmul.f32 %v239_v4, %v220_v10  ;;  %v276_v12 = vmul.f32 %v275_v8, %v260_v55  ;;  %v265_v17 = vmul.f32 %v264_v9, %v260_v55 }
 0x151   :  { %v229_v19 = vmul.f32 %v228_v20, %v220_v10 }
 0x152   :  { %v241_v14 = vadd.f32 1.0, %v240_v11  ;;  %v277_v16 = vadd.f32 0.112945676, %v276_v12  ;;  %v266_v22 = vadd.f32 0.05243302, %v265_v17 }
 0x153   :  { %v230_v29 = vadd.f32 1.1283791, %v229_v19 }
 0x154   :  { %1097 = vrcp.f32 %v241_v14  ;;  %v278_v18 = vmul.f32 %v277_v16, %v260_v55  ;;  %v267_v26 = vmul.f32 %v266_v22, %v260_v55  ;;  %v253_v28 = vand.u32 2147483648, %v241_v14 }
 0x155   :  { %v251_v31 = vand.u32 2147483647, %v241_v14  ;;  %vm247_vm12 = vweird.f32 %v241_v14  ;;  %v231_v34 = vmul.f32 %v230_v29, %v1211_v36 }
 0x156   :  { %v279_v21 = vadd.f32 0.4994258, %v278_v18  ;;  %v268_v32 = vadd.f32 0.18741608, %v267_v26  ;;  %v254_v33 = vor.u32 1.1754944e-38, %v253_v28  ;;  %v1150_v26 = vmov 0  }
 0x157   :  { %vm252_vm14 = vcmp.eq.f32.partialorder %v251_v31, 8.507059e+37  ;;  %1082 = vset.pattern.permute.xlu1 %v1150_v26  ;;  %1080 = vset.pattern.permute.xlu0 %v1150_v26 }
 0x158   :  { %v280_v23 = vmul.f32 %v279_v21, %v260_v55  ;;  %v269_v39 = vmul.f32 %v268_v32, %v260_v55 }
 0x15a   :  { %v1098_v24 = vpop.eup %1097  ;;  %v281_v25 = vadd.f32 1.0, %v280_v23  ;;  %v270_v45 = vadd.f32 1.1283791, %v269_v39 }
 0x15b   :  { %v243_v6 = vmul.f32 %v1098_v24, %v241_v14  ;;  %vm248_vm11 = vweird.f32 %v1098_v24 }
 0x15c   :  { %1099 = vrcp.f32 %v281_v25  ;;  %vm249_vm13 = vmor %vm247_vm12, %vm248_vm11  ;;  %v293_v43 = vand.u32 2147483648, %v281_v25  ;;  %v291_v48 = vand.u32 2147483647, %v281_v25  ;;  %vm287_vm1 = vweird.f32 %v281_v25 }
 0x15d   :  { %v244_v27 = vsub.f32 1.0, %v243_v6  ;;  %v271_v53 = vmul.f32 %v270_v45, %v1219_v47 }
 0x15e   :  { %v294_v36 = vor.u32 1.1754944e-38, %v293_v43  ;;  %vm292_vm3 = vcmp.eq.f32.partialorder %v291_v48, 8.507059e+37 }
 0x15f   :  { %v245_v30 = vmul.f32 %v1098_v24, %v244_v27 }
 0x161   :  { %v246_v5 = vadd.f32 %v1098_v24, %v245_v30 }
 0x162   :  { %v1100_v13 = vpop.eup %1099 }
 0x163   :  { %v250_v37 = vsel %vm249_vm13, %v1098_v24, %v246_v5  ;;  %v283_v10 = vmul.f32 %v1100_v13, %v281_v25  ;;  %vm288_vm15 = vweird.f32 %v1100_v13  ;;  %vm651_vm13 = vcmask 1043456  }
 0x164   :  { %v255_v38 = vsel %vm252_vm14, %v254_v33, %v250_v37  ;;  %vm289_vm2 = vmor %vm287_vm1, %vm288_vm15 }
 0x165   :  { %v256_v40 = vmul.f32 %v255_v38, %v231_v34  ;;  %v284_v41 = vsub.f32 1.0, %v283_v10 }
 0x167   :  { %v1046_v42 = vclamps-f32 %v256_v40, 1.0  ;;  %v285_v46 = vmul.f32 %v1100_v13, %v284_v41 }
 0x169   :  { %v299_v50 = vadd.f32 1.0, %v1046_v42  ;;  %v286_v51 = vadd.f32 %v1100_v13, %v285_v46 }
 0x16b   :  { %v301_v52 = vmul.f32 %v299_v50, %v215_v49  ;;  %v290_v54 = vsel %vm289_vm2, %v1100_v13, %v286_v51 }
 0x16c   :  { %v295_v55 = vsel %vm292_vm3, %v294_v36, %v290_v54 }
 0x16d   :  { %1048 = vmatmul.msk.f32.vlgmr.msrb.gmra.mxu3 %vm307_vm10, %v301_v52  ;;  %v296_v56 = vmul.f32 %v295_v55, %v271_v53 }
 0x16f   :  { %v1047_v57 = vclamps-f32 %v296_v56, 1.0 }
 0x171   :  { %v300_v59 = vadd.f32 1.0, %v1047_v57 }
 0x173   :  { %v302_v60 = vmul.f32 %v300_v59, %v216_v58 }
 0x175   :  { %1049 = vmatmul.msk.f32.gmra.mxu3 %vm307_vm10, %v302_v60 }
 0x1bd   :  { %v452_v61 = vpop.f32.mrf.mxu0 }
 0x1be   :  { %v1230_v62 = vadd.f32 %v1087_v35, %v452_v61 }
 0x1c0   :  { %v1233_v63 = vmul.f32 0.70710677, %v1230_v62 }
 0x1c2   :  { %v462_v47 = vmul.f32 %v1233_v63, %v1233_v63 }
 0x1c4   :  { %v463_v0 = vmin.f32 %v462_v47, 16.0 }
 0x1c5   :  { %v455_v1 = vpop.f32.mrf.mxu0 }
 0x1c6   :  { %v464_v2 = vmul.f32 2.1237322e-06, %v463_v0  ;;  %v1237_v3 = vadd.f32 %v1087_v35, %v455_v1  ;;  %v475_v44 = vmul.f32 3.8918573e-05, %v463_v0  ;;  %v1088_v1 = vld [vmem:[#allocation2 + $0x70] ss:$0 sm:$0xff] }
 0x1c8   :  { %v465_v4 = vadd.f32 0.00028619796, %v464_v2  ;;  %v1240_v7 = vmul.f32 0.70710677, %v1237_v3  ;;  %v476_v8 = vadd.f32 0.001143296, %v475_v44 }
 0x1ca   :  { %v466_v11 = vmul.f32 %v465_v4, %v463_v0  ;;  %v502_v9 = vmul.f32 %v1240_v7, %v1240_v7  ;;  %v477_v12 = vmul.f32 %v476_v8, %v463_v0 }
 0x1cc   :  { %v503_v14 = vmin.f32 %v502_v9, 16.0  ;;  %v478_v15 = vadd.f32 0.014752088, %v477_v12  ;;  %v467_v16 = vadd.f32 0.0036580483, %v466_v11  ;;  %v458_v11 = vmul.f32 0.5, %v1230_v62 }
 0x1ce   :  { %v504_v17 = vmul.f32 2.1237322e-06, %v503_v14  ;;  %v515_v18 = vmul.f32 3.8918573e-05, %v503_v14  ;;  %v479_v20 = vmul.f32 %v478_v15, %v463_v0  ;;  %v468_v24 = vmul.f32 %v467_v16, %v463_v0 }
 0x1d0   :  { %v505_v21 = vadd.f32 0.00028619796, %v504_v17  ;;  %v516_v22 = vadd.f32 0.001143296, %v515_v18  ;;  %v480_v23 = vadd.f32 0.112945676, %v479_v20 }
 0x1d1   :  { %v469_v30 = vadd.f32 0.05243302, %v468_v24 }
 0x1d2   :  { %v506_v19 = vmul.f32 %v505_v21, %v503_v14  ;;  %v517_v6 = vmul.f32 %v516_v22, %v503_v14  ;;  %v481_v25 = vmul.f32 %v480_v23, %v463_v0  ;;  %v459_v23 = vmul.f32 0.5, %v1237_v3 }
 0x1d3   :  { %v470_v34 = vmul.f32 %v469_v30, %v463_v0 }
 0x1d4   :  { %v518_v27 = vadd.f32 0.014752088, %v517_v6  ;;  %v507_v28 = vadd.f32 0.0036580483, %v506_v19  ;;  %v482_v29 = vadd.f32 0.4994258, %v481_v25 }
 0x1d5   :  { %v471_v10 = vadd.f32 0.18741608, %v470_v34 }
 0x1d6   :  { %v519_v31 = vmul.f32 %v518_v27, %v503_v14  ;;  %v483_v32 = vmul.f32 %v482_v29, %v463_v0  ;;  %v508_v33 = vmul.f32 %v507_v28, %v503_v14 }
 0x1d7   :  { %v472_v45 = vmul.f32 %v471_v10, %v463_v0 }
 0x1d8   :  { %v520_v5 = vadd.f32 0.112945676, %v519_v31  ;;  %v484_v13 = vadd.f32 1.0, %v483_v32  ;;  %v509_v39 = vadd.f32 0.05243302, %v508_v33  ;;  %v1151_v31 = vmov 1  }
 0x1d9   :  { %v473_v51 = vadd.f32 1.1283791, %v472_v45 }
 0x1da   :  { %v521_v37 = vmul.f32 %v520_v5, %v503_v14  ;;  %1101 = vrcp.f32 %v484_v13  ;;  %v510_v43 = vmul.f32 %v509_v39, %v503_v14  ;;  %v496_v50 = vand.u32 2147483648, %v484_v13 }
 0x1db   :  { %v494_v36 = vand.u32 2147483647, %v484_v13  ;;  %vm490_vm5 = vweird.f32 %v484_v13  ;;  %v474_v58 = vmul.f32 %v473_v51, %v1233_v63 }
 0x1dc   :  { %v522_v38 = vadd.f32 0.4994258, %v521_v37  ;;  %v511_v49 = vadd.f32 0.18741608, %v510_v43  ;;  %v497_v56 = vor.u32 1.1754944e-38, %v496_v50 }
 0x1dd   :  { %vm495_vm7 = vcmp.eq.f32.partialorder %v494_v36, 8.507059e+37 }
 0x1de   :  { %v523_v40 = vmul.f32 %v522_v38, %v503_v14  ;;  %v512_v55 = vmul.f32 %v511_v49, %v503_v14 }
 0x1e0   :  { %v524_v41 = vadd.f32 1.0, %v523_v40  ;;  %v1102_v42 = vpop.eup %1101  ;;  %v513_v0 = vadd.f32 1.1283791, %v512_v55 }
 0x1e1   :  { %v486_v46 = vmul.f32 %v1102_v42, %v484_v13  ;;  %vm491_vm4 = vweird.f32 %v1102_v42 }
 0x1e2   :  { %1103 = vrcp.f32 %v524_v41  ;;  %vm492_vm6 = vmor %vm490_vm5, %vm491_vm4  ;;  %v536_v47 = vand.u32 2147483648, %v524_v41  ;;  %v534_v44 = vand.u32 2147483647, %v524_v41  ;;  %vm530_vm9 = vweird.f32 %v524_v41 }
 0x1e3   :  { %v487_v48 = vsub.f32 1.0, %v486_v46  ;;  %v514_v14 = vmul.f32 %v513_v0, %v1240_v7  ;;  %vm647_vm5 = vcmask 31744  }
 0x1e4   :  { %v537_v63 = vor.u32 1.1754944e-38, %v536_v47  ;;  %vm535_vm12 = vcmp.eq.f32.partialorder %v534_v44, 8.507059e+37 }
 0x1e5   :  { %v488_v52 = vmul.f32 %v1102_v42, %v487_v48  ;;  %v675_v48 = vld [vmem:[#allocation2 + $0xd8] sm:$0xf] }
 0x1e6   :  { %1060 = vmatpush.msk.msrb.mxu2 %vm651_vm13, %v675_v48 }
 0x1e7   :  { %v489_v54 = vadd.f32 %v1102_v42, %v488_v52 }
 0x1e8   :  { %v1104_v53 = vpop.eup %1103 }
 0x1e9   :  { %v526_v57 = vmul.f32 %v1104_v53, %v524_v41  ;;  %v493_v59 = vsel %vm492_vm6, %v1102_v42, %v489_v54  ;;  %vm531_vm8 = vweird.f32 %v1104_v53 }
 0x1ea   :  { %v498_v60 = vsel %vm495_vm7, %v497_v56, %v493_v59  ;;  %vm532_vm11 = vmor %vm530_vm9, %vm531_vm8 }
 0x1eb   :  { %v527_v35 = vsub.f32 1.0, %v526_v57  ;;  %v499_v61 = vmul.f32 %v498_v60, %v474_v58 }
 0x1ed   :  { %v528_v2 = vmul.f32 %v1104_v53, %v527_v35  ;;  %v1054_v4 = vclamps-f32 %v499_v61, 1.0 }
 0x1ef   :  { %v529_v8 = vadd.f32 %v1104_v53, %v528_v2  ;;  %v542_v12 = vadd.f32 1.0, %v1054_v4 }
 0x1f0   :  { %v331_v9 = vpop.f32.mrf.mxu3 }
 0x1f1   :  { %v1247_v15 = vadd.f32 %v1088_v1, %v331_v9  ;;  %v533_v16 = vsel %vm532_vm11, %v1104_v53, %v529_v8  ;;  %v544_v17 = vmul.f32 %v542_v12, %v458_v11 }
 0x1f2   :  { %v538_v18 = vsel %vm535_vm12, %v537_v63, %v533_v16  ;;  %vm715_vm12 = vcmask 1041408  }
 0x1f3   :  { %v1250_v20 = vmul.f32 0.70710677, %v1247_v15  ;;  %v539_v21 = vmul.f32 %v538_v18, %v514_v14  ;;  %550 = vperm.xlu1 %1082, %v544_v17  }
 0x1f5   :  { %v341_v62 = vmul.f32 %v1250_v20, %v1250_v20  ;;  %v1055_v22 = vclamps-f32 %v539_v21, 1.0 }
 0x1f7   :  { %v342_v24 = vmin.f32 %v341_v62, 16.0  ;;  %v543_v19 = vadd.f32 1.0, %v1055_v22 }
 0x1f8   :  { %v334_v25 = vpop.f32.mrf.mxu3 }
 0x1f9   :  { %v343_v7 = vmul.f32 2.1237322e-06, %v342_v24  ;;  %v354_v6 = vmul.f32 3.8918573e-05, %v342_v24  ;;  %v545_v26 = vmul.f32 %v543_v19, %v459_v23  ;;  %v1255_v27 = vadd.f32 %v1088_v1, %v334_v25 }
 0x1fb   :  { %v344_v28 = vadd.f32 0.00028619796, %v343_v7  ;;  %v355_v29 = vadd.f32 0.001143296, %v354_v6  ;;  %555 = vperm.xlu0 %1080, %v545_v26   ;;  %v1258_v30 = vmul.f32 0.70710677, %v1255_v27  ;;  %1083 = vset.pattern.permute.xlu1 %v1151_v31 }
 0x1fc   :  { %563 = vperm.xlu1 %1083, %v544_v17  }
 0x1fd   :  { %v345_v32 = vmul.f32 %v344_v28, %v342_v24  ;;  %v356_v5 = vmul.f32 %v355_v29, %v342_v24  ;;  %v381_v3 = vmul.f32 %v1258_v30, %v1258_v30  ;;  %v337_v29 = vmul.f32 0.5, %v1247_v15 }
 0x1ff   :  { %v357_v33 = vadd.f32 0.014752088, %v356_v5  ;;  %v346_v13 = vadd.f32 0.0036580483, %v345_v32  ;;  %v382_v34 = vmin.f32 %v381_v3, 16.0 }
 0x201   :  { %v358_v37 = vmul.f32 %v357_v33, %v342_v24  ;;  %v383_v38 = vmul.f32 2.1237322e-06, %v382_v34  ;;  %v394_v39 = vmul.f32 3.8918573e-05, %v382_v34  ;;  %v347_v40 = vmul.f32 %v346_v13, %v342_v24 }
 0x203   :  { %v359_v10 = vadd.f32 0.112945676, %v358_v37  ;;  %1081 = vset.pattern.permute.xlu0 %v1151_v31  ;;  %v384_v41 = vadd.f32 0.00028619796, %v383_v38  ;;  %v395_v42 = vadd.f32 0.001143296, %v394_v39 }
 0x204   :  { %567 = vperm.xlu0 %1081, %v545_v26   ;;  %v348_v50 = vadd.f32 0.05243302, %v347_v40  ;;  %v338_v38 = vmul.f32 0.5, %v1255_v27  ;;  %v574_v27 = vld [vmem:[#allocation2 + $0xb8] sm:$0x3] }
 0x205   :  { %v360_v43 = vmul.f32 %v359_v10, %v342_v24  ;;  %v385_v45 = vmul.f32 %v384_v41, %v382_v34  ;;  %v396_v46 = vmul.f32 %v395_v42, %v382_v34  ;;  %v547_v41 = vld [vmem:[#allocation2 + $0x98] sm:$0xff]  ;;  %v560_v42 = vld [vmem:[#allocation2 + $0xa0] sm:$0xff] }
 0x206   :  { %v349_v55 = vmul.f32 %v348_v50, %v342_v24 }
 0x207   :  { %v361_v49 = vadd.f32 0.4994258, %v360_v43  ;;  %v397_v51 = vadd.f32 0.014752088, %v396_v46  ;;  %v386_v36 = vadd.f32 0.0036580483, %v385_v45 }
 0x208   :  { %v350_v59 = vadd.f32 0.18741608, %v349_v55  ;;  %v561_v45 = vld [vmem:[#allocation2 + $0xa8] sm:$0xff] }
 0x209   :  { %v362_v52 = vmul.f32 %v361_v49, %v342_v24  ;;  %v398_v53 = vmul.f32 %v397_v51, %v382_v34  ;;  %v387_v57 = vmul.f32 %v386_v36, %v382_v34 }
 0x20a   :  { %v351_v0 = vmul.f32 %v350_v59, %v342_v24 }
 0x20b   :  { %v363_v54 = vadd.f32 1.0, %v362_v52  ;;  %v399_v56 = vadd.f32 0.112945676, %v398_v53  ;;  %v388_v35 = vadd.f32 0.05243302, %v387_v57 }
 0x20c   :  { %v352_v11 = vadd.f32 1.1283791, %v351_v0  ;;  %v1089_v53 = vld [vmem:[#allocation2 + $0xb0] ss:$0 sm:$0xff] }
 0x20d   :  { %1105 = vrcp.f32 %v363_v54  ;;  %v400_v58 = vmul.f32 %v399_v56, %v382_v34  ;;  %v389_v44 = vmul.f32 %v388_v35, %v382_v34  ;;  %v375_v8 = vand.u32 2147483648, %v363_v54 }
 0x20e   :  { %v373_v12 = vand.u32 2147483647, %v363_v54  ;;  %vm369_vm15 = vweird.f32 %v363_v54  ;;  %v353_v18 = vmul.f32 %v352_v11, %v1250_v20  ;;  %v646_v11 = vld [vmem:[#allocation2 + $0xd0] sm:$0xf] }
 0x20f   :  { %v401_v60 = vadd.f32 0.4994258, %v400_v58  ;;  %v390_v63 = vadd.f32 0.18741608, %v389_v44  ;;  %v376_v16 = vor.u32 1.1754944e-38, %v375_v8  ;;  %1058 = vmatpush.msk.msra.mxu1 %vm651_vm13, %v646_v11  ;;  %vm708_vm13 = vcmask 15360  }
 0x210   :  { %vm374_vm2 = vcmp.eq.f32.partialorder %v373_v12, 8.507059e+37  ;;  %v864_v11 = vld [vmem:[#allocation2 + $0x110] sm:$0xff] }
 0x211   :  { %v402_v61 = vmul.f32 %v401_v60, %v382_v34  ;;  %v391_v22 = vmul.f32 %v390_v63, %v382_v34 }
 0x213   :  { %v1106_v47 = vpop.eup %1105  ;;  %v403_v2 = vadd.f32 1.0, %v402_v61  ;;  %v392_v25 = vadd.f32 1.1283791, %v391_v22 }
 0x214   :  { %v365_v1 = vmul.f32 %v1106_v47, %v363_v54  ;;  %vm370_vm14 = vweird.f32 %v1106_v47 }
 0x215   :  { %1107 = vrcp.f32 %v403_v2  ;;  %vm371_vm1 = vmor %vm369_vm15, %vm370_vm14  ;;  %v415_v6 = vand.u32 2147483648, %v403_v2  ;;  %v413_v28 = vand.u32 2147483647, %v403_v2  ;;  %vm409_vm4 = vweird.f32 %v403_v2 }
 0x216   :  { %v366_v4 = vsub.f32 1.0, %v365_v1  ;;  %v393_v3 = vmul.f32 %v392_v25, %v1258_v30  ;;  %v546_v30 = vld [vmem:[#allocation2 + $0x90] sm:$0xff] }
 0x217   :  { %v416_v5 = vor.u32 1.1754944e-38, %v415_v6  ;;  %vm414_vm7 = vcmp.eq.f32.partialorder %v413_v28, 8.507059e+37 }
 0x218   :  { %v367_v9 = vmul.f32 %v1106_v47, %v366_v4 }
 0x21a   :  { %v368_v14 = vadd.f32 %v1106_v47, %v367_v9 }
 0x21b   :  { %v1108_v17 = vpop.eup %1107 }
 0x21c   :  { %v372_v21 = vsel %vm371_vm1, %v1106_v47, %v368_v14  ;;  %v405_v23 = vmul.f32 %v1108_v17, %v403_v2  ;;  %vm410_vm3 = vweird.f32 %v1108_v17 }
 0x21d   :  { %v377_v62 = vsel %vm374_vm2, %v376_v16, %v372_v21  ;;  %vm411_vm6 = vmor %vm409_vm4, %vm410_vm3 }
 0x21e   :  { %v378_v24 = vmul.f32 %v377_v62, %v353_v18  ;;  %v406_v19 = vsub.f32 1.0, %v405_v23 }
 0x220   :  { %v1050_v7 = vclamps-f32 %v378_v24, 1.0  ;;  %v407_v26 = vmul.f32 %v1108_v17, %v406_v19 }
 0x222   :  { %v421_v31 = vadd.f32 1.0, %v1050_v7  ;;  %v408_v32 = vadd.f32 %v1108_v17, %v407_v26 }
 0x224   :  { %v423_v20 = vmul.f32 %v421_v31, %v337_v29  ;;  %v412_v33 = vsel %vm411_vm6, %v1108_v17, %v408_v32 }
 0x225   :  { %v417_v13 = vsel %vm414_vm7, %v416_v5, %v412_v33 }
 0x226   :  { %1061 = vmatmul.msk.f32.vlgmr.msrb.gmra.mxu2 %vm647_vm5, %v423_v20  ;;  %v418_v34 = vmul.f32 %v417_v13, %v393_v3  ;;  %v742_v13 = vld [vmem:[#allocation2 + $0xe0] sm:$0xff] }
 0x227   :  { %758 = vmatpush.msrb.mxu1 %v742_v13 }
 0x228   :  { %v1051_v37 = vclamps-f32 %v418_v34, 1.0  ;;  %v1119_v34 = vld [vmem:[%s1324_s0] sm:$0xff] }
 0x22a   :  { %v422_v39 = vadd.f32 1.0, %v1051_v37  ;;  %v1120_v37 = vld [vmem:[%s1324_s0 + $0x8] sm:$0xff] }
 0x22c   :  { %v424_v15 = vmul.f32 %v422_v39, %v338_v38  ;;  %v644_v38 = vld [vmem:[#allocation2 + $0xc0] sm:$0xff] }
 0x22e   :  { %1062 = vmatmul.msk.f32.gmra.mxu2 %vm647_vm5, %v424_v15  ;;  %v645_v15 = vld [vmem:[#allocation2 + $0xc8] sm:$0xff] }
 0x265   :  { %v551_v10 = vpop.permute.xlu1 %550 }
 0x266   :  { %v558_v51 = vmul.f32 %v551_v10, %v546_v30  ;;  %v875_v10 = vld [vmem:[#allocation2 + $0x168] sm:$0xff] }
 0x267   :  { %878 = vmatpush.msrb.mxu0 %v875_v10 }
 0x26d   :  { %v556_v40 = vpop.permute.xlu0 %555 }
 0x26e   :  { %v564_v43 = vpop.permute.xlu1 %563  ;;  %v559_v48 = vmul.f32 %v556_v40, %v547_v41 }
 0x26f   :  { %v570_v49 = vmul.f32 %v564_v43, %v560_v42  ;;  %v874_v42 = vld [vmem:[#allocation2 + $0x160] sm:$0xff] }
 0x270   :  { %879 = vmatpush.msrb.mxu0 %v874_v42 }
 0x271   :  { %v572_v36 = vadd.f32 %v570_v49, %v558_v51  ;;  %v871_v49 = vld [vmem:[#allocation2 + $0x148] sm:$0xff]  ;;  %v870_v51 = vld [vmem:[#allocation2 + $0x140] sm:$0xff] }
 0x276   :  { %v568_v46 = vpop.permute.xlu0 %567 }
 0x277   :  { %v571_v50 = vmul.f32 %v568_v46, %v561_v45  ;;  %v873_v45 = vld [vmem:[#allocation2 + $0x158] sm:$0xff]  ;;  %v1090_v46 = vld [vmem:[#allocation2 + $0xe8] ss:$0 sm:$0xff] }
 0x278   :  { %880 = vmatpush.msrb.mxu0 %v873_v45 }
 0x279   :  { %v573_v52 = vadd.f32 %v571_v50, %v559_v48  ;;  %v872_v48 = vld [vmem:[#allocation2 + $0x150] sm:$0xff] }
 0x27a   :  { %881 = vmatpush.msrb.mxu0 %v872_v48 }
 0x27b   :  { %594 = vmatpush.msra.mxu3 %v573_v52 }
 0x27c   :  { %882 = vmatpush.msrb.mxu0 %v871_v49 }
 0x27d   :  { %595 = vmatpush.msra.mxu3 %v572_v36  ;;  %v869_v36 = vld [vmem:[#allocation2 + $0x138] sm:$0xff] }
 0x27e   :  { %1056 = vmatmul.msk.f32.vlgmr.msra.gmra.mxu3 %vm307_vm10, %v574_v27  ;;  %883 = vmatpush.msrb.mxu0 %v870_v51 }
 0x280   :  { %884 = vmatpush.msrb.mxu0 %v869_v36 }
 0x2a9   :  { %v702_v40 = vpop.f32.mrf.mxu2 }
 0x2b1   :  { %v705_v27 = vpop.f32.mrf.mxu2 }
 0x301   :  { %v597_v54 = vpop.f32.mrf.mxu3 }
 0x302   :  { %v598_v55 = vadd.f32 %v1089_v53, %v597_v54 }
 0x304   :  { %v601_v56 = vmul.f32 0.70710677, %v598_v55  ;;  %v600_v5 = vmul.f32 0.5, %v598_v55 }
 0x306   :  { %v602_v57 = vmul.f32 %v601_v56, %v601_v56 }
 0x308   :  { %v603_v58 = vmin.f32 %v602_v57, 16.0 }
 0x30a   :  { %v604_v59 = vmul.f32 2.1237322e-06, %v603_v58  ;;  %v615_v60 = vmul.f32 3.8918573e-05, %v603_v58 }
 0x30c   :  { %v605_v35 = vadd.f32 0.00028619796, %v604_v59  ;;  %v616_v61 = vadd.f32 0.001143296, %v615_v60  ;;  %v867_v59 = vld [vmem:[#allocation2 + $0x128] sm:$0xff] }
 0x30e   :  { %v606_v47 = vmul.f32 %v605_v35, %v603_v58  ;;  %v617_v0 = vmul.f32 %v616_v61, %v603_v58  ;;  %v866_v61 = vld [vmem:[#allocation2 + $0x120] sm:$0xff] }
 0x310   :  { %v618_v1 = vadd.f32 0.014752088, %v617_v0  ;;  %v607_v2 = vadd.f32 0.0036580483, %v606_v47 }
 0x312   :  { %v619_v44 = vmul.f32 %v618_v1, %v603_v58  ;;  %v608_v8 = vmul.f32 %v607_v2, %v603_v58  ;;  %v865_v2 = vld [vmem:[#allocation2 + $0x118] sm:$0xff] }
 0x314   :  { %v620_v4 = vadd.f32 0.112945676, %v619_v44  ;;  %v609_v63 = vadd.f32 0.05243302, %v608_v8 }
 0x316   :  { %v621_v9 = vmul.f32 %v620_v4, %v603_v58  ;;  %v610_v17 = vmul.f32 %v609_v63, %v603_v58 }
 0x318   :  { %v622_v12 = vadd.f32 0.4994258, %v621_v9  ;;  %v611_v18 = vadd.f32 0.18741608, %v610_v17 }
 0x31a   :  { %v623_v14 = vmul.f32 %v622_v12, %v603_v58  ;;  %v612_v62 = vmul.f32 %v611_v18, %v603_v58 }
 0x31c   :  { %v624_v16 = vadd.f32 1.0, %v623_v14  ;;  %v613_v19 = vadd.f32 1.1283791, %v612_v62  ;;  %v863_v14 = vld [vmem:[#allocation2 + $0x108] sm:$0xff] }
 0x31e   :  { %1109 = vrcp.f32 %v624_v16  ;;  %v636_v24 = vand.u32 2147483648, %v624_v16  ;;  %v634_v6 = vand.u32 2147483647, %v624_v16  ;;  %vm630_vm8 = vweird.f32 %v624_v16 }
 0x31f   :  { %v614_v28 = vmul.f32 %v613_v19, %v601_v56  ;;  %v868_v56 = vld [vmem:[#allocation2 + $0x130] sm:$0xff] }
 0x320   :  { %v637_v26 = vor.u32 1.1754944e-38, %v636_v24  ;;  %vm635_vm11 = vcmp.eq.f32.partialorder %v634_v6, 8.507059e+37  ;;  %885 = vmatpush.msrb.mxu0 %v868_v56  ;;  %v861_v24 = vld [vmem:[#allocation2 + $0xf8] sm:$0xff] }
 0x322   :  { %886 = vmatpush.msrb.mxu0 %v867_v59 }
 0x324   :  { %v1110_v21 = vpop.eup %1109  ;;  %887 = vmatpush.msrb.mxu0 %v866_v61 }
 0x325   :  { %v626_v22 = vmul.f32 %v1110_v21, %v624_v16  ;;  %vm631_vm10 = vweird.f32 %v1110_v21 }
 0x326   :  { %vm632_vm9 = vmor %vm630_vm8, %vm631_vm10  ;;  %888 = vmatpush.msrb.mxu0 %v865_v2 }
 0x327   :  { %v627_v23 = vsub.f32 1.0, %v626_v22 }
 0x328   :  { %889 = vmatpush.msrb.mxu0 %v864_v11 }
 0x329   :  { %v628_v7 = vmul.f32 %v1110_v21, %v627_v23 }
 0x32a   :  { %890 = vmatpush.msrb.mxu0 %v863_v14 }
 0x32b   :  { %v629_v25 = vadd.f32 %v1110_v21, %v628_v7 }
 0x32d   :  { %v633_v29 = vsel %vm632_vm9, %v1110_v21, %v629_v25  ;;  %v862_v21 = vld [vmem:[#allocation2 + $0x100] sm:$0xff]  ;;  %v860_v25 = vld [vmem:[#allocation2 + $0xf0] sm:$0xff] }
 0x32e   :  { %v638_v31 = vsel %vm635_vm11, %v637_v26, %v633_v29  ;;  %891 = vmatpush.msrb.mxu0 %v862_v21 }
 0x32f   :  { %v639_v32 = vmul.f32 %v638_v31, %v614_v28 }
 0x330   :  { %892 = vmatpush.msrb.mxu0 %v861_v24 }
 0x331   :  { %v1057_v20 = vclamps-f32 %v639_v32, 1.0 }
 0x332   :  { %893 = vmatpush.msrb.mxu0 %v860_v25 }
 0x333   :  { %v642_v3 = vadd.f32 1.0, %v1057_v20 }
 0x335   :  { %v643_v33 = vmul.f32 %v642_v3, %v600_v5 }
 0x337   :  { %1059 = vmatmul.msk.f32.vlgmr.msra.gmra.mxu1 %vm647_vm5, %v643_v33 }
 0x33f   :  { %1066 = vmatmul.msk.f32.vlgmr.msrb.gmra.mxu1 %vm32_vm0, %v1119_v34 }
 0x347   :  { %1067 = vmatmul.msk.f32.gmra.mxu1 %vm32_vm0, %v1120_v37 }
 0x3b4   :  { %v672_v39 = vpop.f32.mrf.mxu1 }
 0x3b5   :  { %1063 = vmatpush.msk.msrb.mxu3 %vm715_vm12, %v672_v39 }
 0x3b6   :  { %1064 = vmatmul.msk.f32.vlgmr.msrb.gmra.mxu3 %vm708_vm13, %v644_v38 }
 0x3bc   :  { %v760_v41 = vpop.f32.mrf.mxu1 }
 0x3be   :  { %1065 = vmatmul.msk.f32.gmra.mxu3 %vm708_vm13, %v645_v15  ;;  %vm999_vm13 = vcmask 523264  }
 0x3c4   :  { %v763_v55 = vpop.f32.mrf.mxu1 }
 0x439   :  { %v736_v43 = vpop.f32.mrf.mxu3 }
 0x43a   :  { %v737_v30 = vadd.f32 %v736_v43, %v702_v40 }
 0x43c   :  { %v766_v50 = vadd.f32 %v760_v41, %v737_v30 }
 0x43e   :  { %v1280_v52 = vadd.f32 %v1090_v46, %v766_v50 }
 0x440   :  { %v1283_v53 = vmul.f32 0.70710677, %v1280_v52 }
 0x441   :  { %v739_v54 = vpop.f32.mrf.mxu3 }
 0x442   :  { %v776_v57 = vmul.f32 %v1283_v53, %v1283_v53  ;;  %v740_v58 = vadd.f32 %v739_v54, %v705_v27 }
 0x444   :  { %v777_v60 = vmin.f32 %v776_v57, 16.0  ;;  %v767_v35 = vadd.f32 %v763_v55, %v740_v58 }
 0x446   :  { %v778_v47 = vmul.f32 2.1237322e-06, %v777_v60  ;;  %v1287_v0 = vadd.f32 %v1090_v46, %v767_v35  ;;  %v789_v1 = vmul.f32 3.8918573e-05, %v777_v60 }
 0x448   :  { %v779_v44 = vadd.f32 0.00028619796, %v778_v47  ;;  %v1290_v4 = vmul.f32 0.70710677, %v1287_v0  ;;  %v790_v8 = vadd.f32 0.001143296, %v789_v1 }
 0x44a   :  { %v780_v9 = vmul.f32 %v779_v44, %v777_v60  ;;  %v816_v12 = vmul.f32 %v1290_v4, %v1290_v4  ;;  %v791_v63 = vmul.f32 %v790_v8, %v777_v60 }
 0x44c   :  { %v817_v16 = vmin.f32 %v816_v12, 16.0  ;;  %v792_v17 = vadd.f32 0.014752088, %v791_v63  ;;  %v781_v18 = vadd.f32 0.0036580483, %v780_v9  ;;  %v772_v12 = vmul.f32 0.5, %v1280_v52 }
 0x44d   :  { %v1091_v52 = vld [vmem:[#allocation2 + $0x170] ss:$0 sm:$0xff] }
 0x44e   :  { %v793_v62 = vmul.f32 %v792_v17, %v777_v60  ;;  %v818_v22 = vmul.f32 2.1237322e-06, %v817_v16  ;;  %v829_v23 = vmul.f32 3.8918573e-05, %v817_v16  ;;  %v782_v6 = vmul.f32 %v781_v18, %v777_v60 }
 0x450   :  { %v794_v19 = vadd.f32 0.112945676, %v793_v62  ;;  %v819_v7 = vadd.f32 0.00028619796, %v818_v22  ;;  %v830_v26 = vadd.f32 0.001143296, %v829_v23 }
 0x451   :  { %v783_v20 = vadd.f32 0.05243302, %v782_v6  ;;  %v773_v23 = vmul.f32 0.5, %v1287_v0 }
 0x452   :  { %v795_v28 = vmul.f32 %v794_v19, %v777_v60  ;;  %v820_v29 = vmul.f32 %v819_v7, %v817_v16  ;;  %v831_v31 = vmul.f32 %v830_v26, %v817_v16 }
 0x453   :  { %v784_v37 = vmul.f32 %v783_v20, %v777_v60  ;;  %v995_v20 = vld [vmem:[#allocation2 + $0x1a8] sm:$0xff] }
 0x454   :  { %v796_v32 = vadd.f32 0.4994258, %v795_v28  ;;  %v832_v5 = vadd.f32 0.014752088, %v831_v31  ;;  %v821_v33 = vadd.f32 0.0036580483, %v820_v29 }
 0x455   :  { %v785_v10 = vadd.f32 0.18741608, %v784_v37  ;;  %v996_v28 = vld [vmem:[#allocation2 + $0x1b0] sm:$0xff] }
 0x456   :  { %v797_v3 = vmul.f32 %v796_v32, %v777_v60  ;;  %v833_v13 = vmul.f32 %v832_v5, %v817_v16  ;;  %v822_v39 = vmul.f32 %v821_v33, %v817_v16  ;;  %1014 = vmatpush.msra.mxu2 %v996_v28 }
 0x457   :  { %v786_v45 = vmul.f32 %v785_v10, %v777_v60 }
 0x458   :  { %v798_v34 = vadd.f32 1.0, %v797_v3  ;;  %v834_v38 = vadd.f32 0.112945676, %v833_v13  ;;  %v823_v41 = vadd.f32 0.05243302, %v822_v39  ;;  %1015 = vmatpush.msra.mxu2 %v995_v20  ;;  %v994_v13 = vld [vmem:[#allocation2 + $0x1a0] sm:$0xff] }
 0x459   :  { %v787_v51 = vadd.f32 1.1283791, %v786_v45  ;;  %v993_v39 = vld [vmem:[#allocation2 + $0x198] sm:$0xff] }
 0x45a   :  { %1111 = vrcp.f32 %v798_v34  ;;  %v835_v15 = vmul.f32 %v834_v38, %v817_v16  ;;  %v824_v48 = vmul.f32 %v823_v41, %v817_v16  ;;  %v810_v50 = vand.u32 2147483648, %v798_v34  ;;  %1016 = vmatpush.msra.mxu2 %v994_v13  ;;  %v992_v41 = vld [vmem:[#allocation2 + $0x190] sm:$0xff] }
 0x45b   :  { %v808_v27 = vand.u32 2147483647, %v798_v34  ;;  %vm804_vm14 = vweird.f32 %v798_v34  ;;  %v788_v58 = vmul.f32 %v787_v51, %v1283_v53  ;;  %v990_v51 = vld [vmem:[#allocation2 + $0x180] sm:$0xff] }
 0x45c   :  { %v836_v40 = vadd.f32 0.4994258, %v835_v15  ;;  %v825_v54 = vadd.f32 0.18741608, %v824_v48  ;;  %v811_v56 = vor.u32 1.1754944e-38, %v810_v50  ;;  %1017 = vmatpush.msra.mxu2 %v993_v39 }
 0x45d   :  { %vm809_vm1 = vcmp.eq.f32.partialorder %v808_v27, 8.507059e+37 }
 0x45e   :  { %v837_v42 = vmul.f32 %v836_v40, %v817_v16  ;;  %v826_v35 = vmul.f32 %v825_v54, %v817_v16  ;;  %1018 = vmatpush.msra.mxu2 %v992_v41 }
 0x460   :  { %v1112_v43 = vpop.eup %1111  ;;  %v838_v46 = vadd.f32 1.0, %v837_v42  ;;  %v827_v8 = vadd.f32 1.1283791, %v826_v35 }
 0x461   :  { %v800_v30 = vmul.f32 %v1112_v43, %v798_v34  ;;  %vm805_vm0 = vweird.f32 %v1112_v43 }
 0x462   :  { %1113 = vrcp.f32 %v838_v46  ;;  %vm806_vm15 = vmor %vm804_vm14, %vm805_vm0  ;;  %v850_v44 = vand.u32 2147483648, %v838_v46  ;;  %v848_v9 = vand.u32 2147483647, %v838_v46  ;;  %vm844_vm3 = vweird.f32 %v838_v46 }
 0x463   :  { %v801_v49 = vsub.f32 1.0, %v800_v30  ;;  %v828_v18 = vmul.f32 %v827_v8, %v1290_v4  ;;  %v991_v30 = vld [vmem:[#allocation2 + $0x188] sm:$0xff] }
 0x464   :  { %v851_v53 = vor.u32 1.1754944e-38, %v850_v44  ;;  %vm849_vm6 = vcmp.eq.f32.partialorder %v848_v9, 8.507059e+37  ;;  %1019 = vmatpush.msra.mxu2 %v991_v30 }
 0x465   :  { %v802_v36 = vmul.f32 %v1112_v43, %v801_v49 }
 0x466   :  { %1020 = vmatpush.msra.mxu2 %v990_v51 }
 0x467   :  { %v803_v55 = vadd.f32 %v1112_v43, %v802_v36 }
 0x468   :  { %v1114_v57 = vpop.eup %1113 }
 0x469   :  { %v807_v59 = vsel %vm806_vm15, %v1112_v43, %v803_v55  ;;  %v840_v61 = vmul.f32 %v1114_v57, %v838_v46  ;;  %vm845_vm2 = vweird.f32 %v1114_v57  ;;  %v989_v55 = vld [vmem:[#allocation2 + $0x178] sm:$0xff] }
 0x46a   :  { %v812_v60 = vsel %vm809_vm1, %v811_v56, %v807_v59  ;;  %vm846_vm4 = vmor %vm844_vm3, %vm845_vm2  ;;  %1021 = vmatpush.msra.mxu2 %v989_v55 }
 0x46b   :  { %v813_v47 = vmul.f32 %v812_v60, %v788_v58  ;;  %v841_v1 = vsub.f32 1.0, %v840_v61 }
 0x46d   :  { %v1068_v2 = vclamps-f32 %v813_v47, 1.0  ;;  %v842_v11 = vmul.f32 %v1114_v57, %v841_v1 }
 0x46f   :  { %v856_v63 = vadd.f32 1.0, %v1068_v2  ;;  %v843_v14 = vadd.f32 %v1114_v57, %v842_v11 }
 0x471   :  { %v858_v17 = vmul.f32 %v856_v63, %v772_v12  ;;  %v847_v16 = vsel %vm846_vm4, %v1114_v57, %v843_v14 }
 0x472   :  { %v852_v21 = vsel %vm849_vm6, %v851_v53, %v847_v16 }
 0x473   :  { %894 = vmatmul.f32.vlgmr.msrb.gmra.mxu0 %v858_v17  ;;  %v853_v62 = vmul.f32 %v852_v21, %v828_v18 }
 0x475   :  { %v1069_v22 = vclamps-f32 %v853_v62, 1.0 }
 0x477   :  { %v857_v24 = vadd.f32 1.0, %v1069_v22 }
 0x479   :  { %v859_v19 = vmul.f32 %v857_v24, %v773_v23 }
 0x47b   :  { %897 = vmatmul.f32.gmra.mxu0 %v859_v19 }
 0x4f0   :  { %v895_v7 = vpop.f32.mrf.mxu0 }
 0x4f1   :  { %v1298_v6 = vadd.f32 %v1091_v52, %v895_v7 }
 0x4f3   :  { %v1301_v25 = vmul.f32 0.70710677, %v1298_v6 }
 0x4f5   :  { %v905_v4 = vmul.f32 %v1301_v25, %v1301_v25 }
 0x4f7   :  { %v906_v26 = vmin.f32 %v905_v4, 16.0 }
 0x4f8   :  { %v898_v32 = vpop.f32.mrf.mxu0 }
 0x4f9   :  { %v907_v29 = vmul.f32 2.1237322e-06, %v906_v26  ;;  %v918_v31 = vmul.f32 3.8918573e-05, %v906_v26  ;;  %v1305_v0 = vadd.f32 %v1091_v52, %v898_v32 }
 0x4fb   :  { %v908_v5 = vadd.f32 0.00028619796, %v907_v29  ;;  %v919_v3 = vadd.f32 0.001143296, %v918_v31  ;;  %v1308_v33 = vmul.f32 0.70710677, %v1305_v0 }
 0x4fc   :  { %v902_v30 = vmul.f32 0.5, %v1305_v0 }
 0x4fd   :  { %v909_v34 = vmul.f32 %v908_v5, %v906_v26  ;;  %v920_v37 = vmul.f32 %v919_v3, %v906_v26  ;;  %v945_v38 = vmul.f32 %v1308_v33, %v1308_v33 }
 0x4ff   :  { %v921_v15 = vadd.f32 0.014752088, %v920_v37  ;;  %v910_v10 = vadd.f32 0.0036580483, %v909_v34  ;;  %v946_v40 = vmin.f32 %v945_v38, 16.0  ;;  %v901_v38 = vmul.f32 0.5, %v1298_v6 }
 0x500   :  { %v1092_v6 = vld [vmem:[#allocation2 + $0x1b8] ss:$0 sm:$0xff] }
 0x501   :  { %v922_v42 = vmul.f32 %v921_v15, %v906_v26  ;;  %v947_v43 = vmul.f32 2.1237322e-06, %v946_v40  ;;  %v958_v45 = vmul.f32 3.8918573e-05, %v946_v40  ;;  %v911_v48 = vmul.f32 %v910_v10, %v906_v26 }
 0x503   :  { %v923_v46 = vadd.f32 0.112945676, %v922_v42  ;;  %v948_v49 = vadd.f32 0.00028619796, %v947_v43  ;;  %v959_v50 = vadd.f32 0.001143296, %v958_v45 }
 0x504   :  { %v912_v57 = vadd.f32 0.05243302, %v911_v48 }
 0x505   :  { %v924_v36 = vmul.f32 %v923_v46, %v906_v26  ;;  %v949_v27 = vmul.f32 %v948_v49, %v946_v40  ;;  %v960_v54 = vmul.f32 %v959_v50, %v946_v40 }
 0x506   :  { %v913_v47 = vmul.f32 %v912_v57, %v906_v26 }
 0x507   :  { %v925_v56 = vadd.f32 0.4994258, %v924_v36  ;;  %v961_v58 = vadd.f32 0.014752088, %v960_v54  ;;  %v950_v60 = vadd.f32 0.0036580483, %v949_v27 }
 0x508   :  { %v914_v8 = vadd.f32 0.18741608, %v913_v47 }
 0x509   :  { %v926_v59 = vmul.f32 %v925_v56, %v906_v26  ;;  %v962_v35 = vmul.f32 %v961_v58, %v946_v40  ;;  %v951_v2 = vmul.f32 %v950_v60, %v946_v40 }
 0x50a   :  { %v915_v14 = vmul.f32 %v914_v8, %v906_v26 }
 0x50b   :  { %v927_v61 = vadd.f32 1.0, %v926_v59  ;;  %v963_v1 = vadd.f32 0.112945676, %v962_v35  ;;  %v952_v9 = vadd.f32 0.05243302, %v951_v2 }
 0x50c   :  { %v916_v62 = vadd.f32 1.1283791, %v915_v14 }
 0x50d   :  { %1115 = vrcp.f32 %v927_v61  ;;  %v964_v44 = vmul.f32 %v963_v1, %v946_v40  ;;  %v953_v18 = vmul.f32 %v952_v9, %v946_v40  ;;  %v939_v21 = vand.u32 2147483648, %v927_v61 }
 0x50e   :  { %v937_v23 = vand.u32 2147483647, %v927_v61  ;;  %vm933_vm10 = vweird.f32 %v927_v61  ;;  %v917_v4 = vmul.f32 %v916_v62, %v1301_v25 }
 0x50f   :  { %v965_v11 = vadd.f32 0.4994258, %v964_v44  ;;  %v954_v24 = vadd.f32 0.18741608, %v953_v18  ;;  %v940_v52 = vor.u32 1.1754944e-38, %v939_v21 }
 0x510   :  { %vm938_vm9 = vcmp.eq.f32.partialorder %v937_v23, 8.507059e+37 }
 0x511   :  { %v966_v12 = vmul.f32 %v965_v11, %v946_v40  ;;  %v955_v29 = vmul.f32 %v954_v24, %v946_v40 }
 0x513   :  { %v1116_v63 = vpop.eup %1115  ;;  %v967_v53 = vadd.f32 1.0, %v966_v12  ;;  %v956_v13 = vadd.f32 1.1283791, %v955_v29 }
 0x514   :  { %v929_v17 = vmul.f32 %v1116_v63, %v927_v61  ;;  %vm934_vm7 = vweird.f32 %v1116_v63 }
 0x515   :  { %1117 = vrcp.f32 %v967_v53  ;;  %vm935_vm8 = vmor %vm933_vm10, %vm934_vm7  ;;  %v979_v3 = vand.u32 2147483648, %v967_v53  ;;  %v977_v37 = vand.u32 2147483647, %v967_v53  ;;  %vm973_vm12 = vweird.f32 %v967_v53 }
 0x516   :  { %v930_v16 = vsub.f32 1.0, %v929_v17  ;;  %v957_v40 = vmul.f32 %v956_v13, %v1308_v33 }
 0x517   :  { %v980_v10 = vor.u32 1.1754944e-38, %v979_v3  ;;  %vm978_vm14 = vcmp.eq.f32.partialorder %v977_v37, 8.507059e+37 }
 0x518   :  { %v931_v22 = vmul.f32 %v1116_v63, %v930_v16 }
 0x51a   :  { %v932_v19 = vadd.f32 %v1116_v63, %v931_v22 }
 0x51b   :  { %v1118_v7 = vpop.eup %1117 }
 0x51c   :  { %v936_v28 = vsel %vm935_vm8, %v1116_v63, %v932_v19  ;;  %v969_v31 = vmul.f32 %v1118_v7, %v967_v53  ;;  %vm974_vm11 = vweird.f32 %v1118_v7 }
 0x51d   :  { %v941_v26 = vsel %vm938_vm9, %v940_v52, %v936_v28  ;;  %vm975_vm0 = vmor %vm973_vm12, %vm974_vm11 }
 0x51e   :  { %v942_v32 = vmul.f32 %v941_v26, %v917_v4  ;;  %v970_v20 = vsub.f32 1.0, %v969_v31 }
 0x520   :  { %v1070_v5 = vclamps-f32 %v942_v32, 1.0  ;;  %v971_v34 = vmul.f32 %v1118_v7, %v970_v20 }
 0x522   :  { %v985_v39 = vadd.f32 1.0, %v1070_v5  ;;  %v972_v15 = vadd.f32 %v1118_v7, %v971_v34 }
 0x524   :  { %v987_v25 = vmul.f32 %v985_v39, %v901_v38  ;;  %v976_v41 = vsel %vm975_vm0, %v1118_v7, %v972_v15 }
 0x525   :  { %v981_v42 = vsel %vm978_vm14, %v980_v10, %v976_v41 }
 0x526   :  { %1072 = vmatmul.msk.f32.vlgmr.msra.gmra.mxu2 %vm999_vm13, %v987_v25  ;;  %v982_v43 = vmul.f32 %v981_v42, %v957_v40 }
 0x528   :  { %v1071_v45 = vclamps-f32 %v982_v43, 1.0 }
 0x52a   :  { %v986_v46 = vadd.f32 1.0, %v1071_v45 }
 0x52c   :  { %v988_v48 = vmul.f32 %v986_v46, %v902_v30 }
 0x52e   :  { %1073 = vmatmul.msk.f32.gmra.mxu2 %vm999_vm13, %v988_v48 }
 0x5a9   :  { %v1023_v49 = vpop.f32.mrf.mxu2 }
 0x5aa   :  { %v1024_v50 = vadd.f32 %v1092_v6, %v1023_v49 }
 0x5ac   :  { %v1029_v51 = vmax.f32 %v1024_v50, 0.0 }
 0x5ae   :  { %1031 = vst.msk [vmem:[%s1326_s2] sm:$0xff] %vm647_vm5, %v1029_v51 }
 0x5b1   :  { %v1026_v33 = vpop.f32.mrf.mxu2 }
 0x5b2   :  { %v1027_v36 = vadd.f32 %v1092_v6, %v1026_v33 }
 0x5b4   :  { %v1030_v27 = vmax.f32 %v1027_v36, 0.0 }
 0x5b6   :  { %1032 = vst.msk [vmem:[%s1326_s2 + $0x8] sm:$0xff] %vm647_vm5, %v1030_v27 }
 0x5b7   :  { %1037 = vsyncpa [#allocation3], 1 }

</bundles_post_ra>
